<compile_context>
chip_gen: v7x
topology: tpu7x:2x2x1
jax: 0.10.0
libtpu: 0.0.40
codegen_flags: <defaults>
</compile_context>

<pallas_src>
import functools

import jax
import jax.numpy as jnp
import numpy as np
from jax.experimental import pallas as pl
from jax.experimental.pallas import tpu as pltpu


def _pren_nms_kernel(scale_ref, scale1_ref,                     # SMEM (prefetch)
                     loc_ref, score_ref, lm_ref, pr_ref,        # VMEM inputs
                     bxyxy_ref, byxyx_ref, scores_ref, lm_out_ref,  # outputs
                     *, v0, v1):
    out_dt = bxyxy_ref.dtype

    pr = pr_ref[...]               # (1, 4, tn)  rows: cx, cy, w, h
    loc = loc_ref[...]             # (1, 4, tn)  rows: dx, dy, dw, dh
    p_xy = pr[:, 0:2, :]           # (1, 2, tn)
    p_wh = pr[:, 2:4, :]           # (1, 2, tn)

    # decode(): center-size -> corner boxes (two rows at a time, f32 math)
    cxy = p_xy + loc[:, 0:2, :] * v0 * p_wh
    wh = p_wh * jnp.exp(loc[:, 2:4, :] * v1)
    x1y1 = cxy - 0.5 * wh
    x2y2 = cxy + 0.5 * wh

    x1 = x1y1[:, 0:1, :] * scale_ref[0]
    y1 = x1y1[:, 1:2, :] * scale_ref[1]
    x2 = x2y2[:, 0:1, :] * scale_ref[2]
    y2 = x2y2[:, 1:2, :] * scale_ref[3]

    # xyxy / yxyx are just different sublane-row orders in channel-major layout
    bxyxy_ref[:, 0:1, :] = x1.astype(out_dt)
    bxyxy_ref[:, 1:2, :] = y1.astype(out_dt)
    bxyxy_ref[:, 2:3, :] = x2.astype(out_dt)
    bxyxy_ref[:, 3:4, :] = y2.astype(out_dt)

    byxyx_ref[:, 0:1, :] = y1.astype(out_dt)
    byxyx_ref[:, 1:2, :] = x1.astype(out_dt)
    byxyx_ref[:, 2:3, :] = y2.astype(out_dt)
    byxyx_ref[:, 3:4, :] = x2.astype(out_dt)

    # scores: class-1 column, already lane-dense (pure pass-through)
    scores_ref[...] = score_ref[...].astype(scores_ref.dtype)

    # decode_landm(): 5 landmark points, rows (2k, 2k+1) = (x, y) of point k
    lm = lm_ref[...]               # (1, 10, tn)
    for k in range(5):
        pt = p_xy + lm[:, 2 * k:2 * k + 2, :] * v0 * p_wh       # (1, 2, tn)
        lm_out_ref[:, 2 * k:2 * k + 1, :] = (
            pt[:, 0:1, :] * scale1_ref[2 * k]).astype(out_dt)
        lm_out_ref[:, 2 * k + 1:2 * k + 2, :] = (
            pt[:, 1:2, :] * scale1_ref[2 * k + 1]).astype(out_dt)


def pren_nms(loc, conf, landms, prior_data, scale, scale1, cfg, *,
             tn=8192, out_dtype=None, channel_major_out=False):
    """RetinaFace post-process decode.

    Returns (boxes_xyxy, boxes_yxyx, scores, landms).  By default outputs use
    the PyTorch layout ([B,N,4], [B,N,4], [B,1,N], [B,N,10]); with
    channel_major_out=True the boxes/landms come back channel-major
    ([B,4,N], [B,4,N], [B,1,N], [B,10,N]) straight from the kernel.
    """
    B, N, _ = loc.shape
    assert N % 128 == 0, "prior count must be a multiple of 128"
    tn = max(128, (min(tn, N) // 128) * 128)
    while N % tn:                      # largest 128-multiple tile dividing N
        tn -= 128
    out_dtype = loc.dtype if out_dtype is None else out_dtype

    # ---- layout plumbing: channel-major so the kernel is lane-dense --------
    loc_cm = jnp.transpose(loc, (0, 2, 1))                   # [B, 4, N]
    lm_cm = jnp.transpose(landms, (0, 2, 1))                 # [B, 10, N]
    pr3 = prior_data if prior_data.ndim == 3 else prior_data[None]
    pr_cm = jnp.transpose(pr3, (0, 2, 1))                    # [1, 4, N]
    score_in = jnp.reshape(conf[:, :, 1], (B, 1, N))         # class-1 slice only

    scale_sm = jnp.asarray(scale, jnp.float32).reshape(4)
    scale1_sm = jnp.asarray(scale1, jnp.float32).reshape(10)

    v0 = float(cfg['variance'][0])
    v1 = float(cfg['variance'][1])
    kernel = functools.partial(_pren_nms_kernel, v0=v0, v1=v1)

    # batch innermost so the shared prior tile stays resident across b
    grid = (N // tn, B)

    out_shapes = (
        jax.ShapeDtypeStruct((B, 4, N), out_dtype),    # boxes_xyxy (channel-major)
        jax.ShapeDtypeStruct((B, 4, N), out_dtype),    # boxes_yxyx (channel-major)
        jax.ShapeDtypeStruct((B, 1, N), out_dtype),    # scores
        jax.ShapeDtypeStruct((B, 10, N), out_dtype),   # landms (channel-major)
    )
    in_specs = [
        pl.BlockSpec((1, 4, tn), lambda i, b, *_: (b, 0, i)),    # loc
        pl.BlockSpec((1, 1, tn), lambda i, b, *_: (b, 0, i)),    # class-1 scores
        pl.BlockSpec((1, 10, tn), lambda i, b, *_: (b, 0, i)),   # landms
        pl.BlockSpec((1, 4, tn), lambda i, b, *_: (0, 0, i)),    # priors (shared)
    ]
    out_specs = (
        pl.BlockSpec((1, 4, tn), lambda i, b, *_: (b, 0, i)),
        pl.BlockSpec((1, 4, tn), lambda i, b, *_: (b, 0, i)),
        pl.BlockSpec((1, 1, tn), lambda i, b, *_: (b, 0, i)),
        pl.BlockSpec((1, 10, tn), lambda i, b, *_: (b, 0, i)),
    )
    grid_spec = pltpu.PrefetchScalarGridSpec(
        num_scalar_prefetch=2,           # scale, scale1 -> SMEM
        grid=grid,
        in_specs=in_specs,
        out_specs=out_specs,
    )
    bx_cm, by_cm, scores, lm_out_cm = pl.pallas_call(
        kernel,
        out_shape=out_shapes,
        grid_spec=grid_spec,
        compiler_params=pltpu.CompilerParams(
            dimension_semantics=("parallel", "parallel")),
    )(scale_sm, scale1_sm, loc_cm, score_in, lm_cm, pr_cm)

    if channel_major_out:
        return bx_cm, by_cm, scores, lm_out_cm

    # layout plumbing back to the PyTorch [B, N, C] output convention
    return (jnp.transpose(bx_cm, (0, 2, 1)),
            jnp.transpose(by_cm, (0, 2, 1)),
            scores,
            jnp.transpose(lm_out_cm, (0, 2, 1)))


def pren_nms_ref(loc, conf, landms, prior_data, scale, scale1, cfg):
    """Pure-JAX reference mirroring the PyTorch module (torch layout)."""
    pr = prior_data if prior_data.ndim == 3 else prior_data[None]
    v0, v1 = cfg['variance']
    cxcy = pr[..., :2] + loc[..., :2] * v0 * pr[..., 2:]
    wh = pr[..., 2:] * jnp.exp(loc[..., 2:] * v1)
    boxes = jnp.concatenate([cxcy - wh / 2, cxcy + wh / 2], axis=2)
    boxes = boxes * jnp.reshape(scale, (1, 1, 4))
    yxyx = jnp.concatenate(
        [boxes[..., 1:2], boxes[..., 0:1], boxes[..., 3:4], boxes[..., 2:3]], axis=2)
    scores = jnp.transpose(conf[..., 1:2], (0, 2, 1))
    parts = [pr[..., :2] + landms[..., 2 * k:2 * k + 2] * v0 * pr[..., 2:]
             for k in range(5)]
    lm = jnp.concatenate(parts, axis=2) * jnp.reshape(scale1, (1, 1, 10))
    return boxes, yxyx, scores, lm


if __name__ == "__main__":
    cfg = {'variance': [0.1, 0.2]}
    B, N = 2, 1024          # small demo: 2 images, 1024 priors
    img_w, img_h = 16.0, 16.0

    key = jax.random.PRNGKey(0)
    k1, k2, k3, k4, k5 = jax.random.split(key, 5)
    loc = jax.random.normal(k1, (B, N, 4), jnp.float32) * 0.1
    conf = jax.random.uniform(k2, (B, N, 2), jnp.float32)
    landms = jax.random.normal(k3, (B, N, 10), jnp.float32) * 0.1
    prior_xy = jax.random.uniform(k4, (1, N, 2), jnp.float32)
    prior_wh = jax.random.uniform(k5, (1, N, 2), jnp.float32,
                                  minval=0.05, maxval=0.3)
    prior_data = jnp.concatenate([prior_xy, prior_wh], axis=2)
    scale = jnp.array([img_w, img_h, img_w, img_h], jnp.float32)
    scale1 = jnp.array([img_w, img_h] * 5, jnp.float32)

    refs = pren_nms_ref(loc, conf, landms, prior_data, scale, scale1, cfg)
    names = ("boxes_xyxy", "boxes_yxyx", "scores", "landms")

    # default path: module (torch) output layout
    outs = pren_nms(loc, conf, landms, prior_data, scale, scale1, cfg)
    outs = jax.block_until_ready(outs)
    for name, got, want in zip(names, outs, refs):
        assert got.shape == want.shape, (name, got.shape, want.shape)
        np.testing.assert_allclose(np.asarray(got), np.asarray(want),
                                   rtol=1e-5, atol=1e-5, err_msg=name)

    # channel-major fast path (for downstream consumers that can index channels)
    outs_cm = pren_nms(loc, conf, landms, prior_data, scale, scale1, cfg,
                       channel_major_out=True)
    outs_cm = jax.block_until_ready(outs_cm)
    for name, got, want in zip(names, outs_cm, refs):
        if name != "scores":
            want = jnp.transpose(want, (0, 2, 1))
        np.testing.assert_allclose(np.asarray(got), np.asarray(want),
                                   rtol=1e-5, atol=1e-5, err_msg=name + "_cm")

    print("KERNEL_OK")
</pallas_src>

<mosaic_0001>
module attributes {stable_mosaic.version = 11 : i64} {
  func.func @_pren_nms_kernel(%arg0: i32, %arg1: i32, %arg2: memref<4xf32, #tpu.memory_space<smem>>, %arg3: memref<10xf32, #tpu.memory_space<smem>>, %arg4: memref<1x4x1024xf32, #tpu.memory_space<vmem>>, %arg5: memref<1x1x1024xf32, #tpu.memory_space<vmem>>, %arg6: memref<1x10x1024xf32, #tpu.memory_space<vmem>>, %arg7: memref<1x4x1024xf32, #tpu.memory_space<vmem>>, %arg8: memref<1x4x1024xf32, #tpu.memory_space<vmem>>, %arg9: memref<1x4x1024xf32, #tpu.memory_space<vmem>>, %arg10: memref<1x1x1024xf32, #tpu.memory_space<vmem>>, %arg11: memref<1x10x1024xf32, #tpu.memory_space<vmem>>) attributes {dimension_semantics = [#tpu.dimension_semantics<parallel>, #tpu.dimension_semantics<parallel>], iteration_bounds = array<i64: 1, 2>, scalar_prefetch = 2 : i64, scratch_operands = 0 : i64, tpu.core_type = #tpu.core_type<tc>, window_params = [{transform_indices = @transform_0, window_bounds = array<i64: 1, 4, 1024>}, {transform_indices = @transform_1, window_bounds = array<i64: 1, 1, 1024>}, {transform_indices = @transform_2, window_bounds = array<i64: 1, 10, 1024>}, {transform_indices = @transform_3, window_bounds = array<i64: 1, 4, 1024>}, {transform_indices = @transform_4, window_bounds = array<i64: 1, 4, 1024>}, {transform_indices = @transform_5, window_bounds = array<i64: 1, 4, 1024>}, {transform_indices = @transform_6, window_bounds = array<i64: 1, 1, 1024>}, {transform_indices = @transform_7, window_bounds = array<i64: 1, 10, 1024>}]} {
    %c0 = arith.constant 0 : index
    %c0_0 = arith.constant 0 : index
    %c0_1 = arith.constant 0 : index
    %0 = vector.load %arg7[%c0, %c0_0, %c0_1] : memref<1x4x1024xf32, #tpu.memory_space<vmem>>, vector<1x4x1024xf32>
    %c0_2 = arith.constant 0 : index
    %c0_3 = arith.constant 0 : index
    %c0_4 = arith.constant 0 : index
    %1 = vector.load %arg4[%c0_2, %c0_3, %c0_4] : memref<1x4x1024xf32, #tpu.memory_space<vmem>>, vector<1x4x1024xf32>
    %2 = vector.extract_strided_slice %0 {offsets = [0, 0, 0], sizes = [1, 2, 1024], strides = [1, 1, 1]} : vector<1x4x1024xf32> to vector<1x2x1024xf32>
    %3 = vector.extract_strided_slice %0 {offsets = [0, 2, 0], sizes = [1, 2, 1024], strides = [1, 1, 1]} : vector<1x4x1024xf32> to vector<1x2x1024xf32>
    %4 = vector.extract_strided_slice %1 {offsets = [0, 0, 0], sizes = [1, 2, 1024], strides = [1, 1, 1]} : vector<1x4x1024xf32> to vector<1x2x1024xf32>
    %cst = arith.constant 1.000000e-01 : f32
    %5 = vector.broadcast %cst : f32 to vector<1x2x1024xf32>
    %6 = arith.mulf %4, %5 : vector<1x2x1024xf32>
    %7 = arith.mulf %6, %3 : vector<1x2x1024xf32>
    %8 = arith.addf %2, %7 : vector<1x2x1024xf32>
    %9 = vector.extract_strided_slice %1 {offsets = [0, 2, 0], sizes = [1, 2, 1024], strides = [1, 1, 1]} : vector<1x4x1024xf32> to vector<1x2x1024xf32>
    %cst_5 = arith.constant 2.000000e-01 : f32
    %10 = vector.broadcast %cst_5 : f32 to vector<1x2x1024xf32>
    %11 = arith.mulf %9, %10 : vector<1x2x1024xf32>
    %12 = math.exp %11 : vector<1x2x1024xf32>
    %13 = arith.mulf %3, %12 : vector<1x2x1024xf32>
    %cst_6 = arith.constant 5.000000e-01 : f32
    %14 = vector.broadcast %cst_6 : f32 to vector<1x2x1024xf32>
    %15 = arith.mulf %14, %13 : vector<1x2x1024xf32>
    %16 = arith.subf %8, %15 : vector<1x2x1024xf32>
    %cst_7 = arith.constant 5.000000e-01 : f32
    %17 = vector.broadcast %cst_7 : f32 to vector<1x2x1024xf32>
    %18 = arith.mulf %17, %13 : vector<1x2x1024xf32>
    %19 = arith.addf %8, %18 : vector<1x2x1024xf32>
    %20 = vector.extract_strided_slice %16 {offsets = [0, 0, 0], sizes = [1, 1, 1024], strides = [1, 1, 1]} : vector<1x2x1024xf32> to vector<1x1x1024xf32>
    %c0_8 = arith.constant 0 : index
    %21 = memref.load %arg2[%c0_8] : memref<4xf32, #tpu.memory_space<smem>>
    %22 = vector.broadcast %21 : f32 to vector<1x1x1024xf32>
    %23 = arith.mulf %20, %22 : vector<1x1x1024xf32>
    %24 = vector.extract_strided_slice %16 {offsets = [0, 1, 0], sizes = [1, 1, 1024], strides = [1, 1, 1]} : vector<1x2x1024xf32> to vector<1x1x1024xf32>
    %c1 = arith.constant 1 : index
    %25 = memref.load %arg2[%c1] : memref<4xf32, #tpu.memory_space<smem>>
    %26 = vector.broadcast %25 : f32 to vector<1x1x1024xf32>
    %27 = arith.mulf %24, %26 : vector<1x1x1024xf32>
    %28 = vector.extract_strided_slice %19 {offsets = [0, 0, 0], sizes = [1, 1, 1024], strides = [1, 1, 1]} : vector<1x2x1024xf32> to vector<1x1x1024xf32>
    %c2 = arith.constant 2 : index
    %29 = memref.load %arg2[%c2] : memref<4xf32, #tpu.memory_space<smem>>
    %30 = vector.broadcast %29 : f32 to vector<1x1x1024xf32>
    %31 = arith.mulf %28, %30 : vector<1x1x1024xf32>
    %32 = vector.extract_strided_slice %19 {offsets = [0, 1, 0], sizes = [1, 1, 1024], strides = [1, 1, 1]} : vector<1x2x1024xf32> to vector<1x1x1024xf32>
    %c3 = arith.constant 3 : index
    %33 = memref.load %arg2[%c3] : memref<4xf32, #tpu.memory_space<smem>>
    %34 = vector.broadcast %33 : f32 to vector<1x1x1024xf32>
    %35 = arith.mulf %32, %34 : vector<1x1x1024xf32>
    %c0_9 = arith.constant 0 : index
    %c0_10 = arith.constant 0 : index
    %c0_11 = arith.constant 0 : index
    %36 = vector.load %arg8[%c0_9, %c0_10, %c0_11] : memref<1x4x1024xf32, #tpu.memory_space<vmem>>, vector<1x1x1024xf32>
    tpu.vector_store %arg8[%c0_9, %c0_10, %c0_11], %23 {strides = array<i32>} : memref<1x4x1024xf32, #tpu.memory_space<vmem>>, vector<1x1x1024xf32>,
    %c0_12 = arith.constant 0 : index
    %c1_13 = arith.constant 1 : index
    %c0_14 = arith.constant 0 : index
    %37 = vector.load %arg8[%c0_12, %c1_13, %c0_14] : memref<1x4x1024xf32, #tpu.memory_space<vmem>>, vector<1x1x1024xf32>
    tpu.vector_store %arg8[%c0_12, %c1_13, %c0_14], %27 {strides = array<i32>} : memref<1x4x1024xf32, #tpu.memory_space<vmem>>, vector<1x1x1024xf32>,
    %c0_15 = arith.constant 0 : index
    %c2_16 = arith.constant 2 : index
    %c0_17 = arith.constant 0 : index
    %38 = vector.load %arg8[%c0_15, %c2_16, %c0_17] : memref<1x4x1024xf32, #tpu.memory_space<vmem>>, vector<1x1x1024xf32>
    tpu.vector_store %arg8[%c0_15, %c2_16, %c0_17], %31 {strides = array<i32>} : memref<1x4x1024xf32, #tpu.memory_space<vmem>>, vector<1x1x1024xf32>,
    %c0_18 = arith.constant 0 : index
    %c3_19 = arith.constant 3 : index
    %c0_20 = arith.constant 0 : index
    %39 = vector.load %arg8[%c0_18, %c3_19, %c0_20] : memref<1x4x1024xf32, #tpu.memory_space<vmem>>, vector<1x1x1024xf32>
    tpu.vector_store %arg8[%c0_18, %c3_19, %c0_20], %35 {strides = array<i32>} : memref<1x4x1024xf32, #tpu.memory_space<vmem>>, vector<1x1x1024xf32>,
    %c0_21 = arith.constant 0 : index
    %c0_22 = arith.constant 0 : index
    %c0_23 = arith.constant 0 : index
    %40 = vector.load %arg9[%c0_21, %c0_22, %c0_23] : memref<1x4x1024xf32, #tpu.memory_space<vmem>>, vector<1x1x1024xf32>
    tpu.vector_store %arg9[%c0_21, %c0_22, %c0_23], %27 {strides = array<i32>} : memref<1x4x1024xf32, #tpu.memory_space<vmem>>, vector<1x1x1024xf32>,
    %c0_24 = arith.constant 0 : index
    %c1_25 = arith.constant 1 : index
    %c0_26 = arith.constant 0 : index
    %41 = vector.load %arg9[%c0_24, %c1_25, %c0_26] : memref<1x4x1024xf32, #tpu.memory_space<vmem>>, vector<1x1x1024xf32>
    tpu.vector_store %arg9[%c0_24, %c1_25, %c0_26], %23 {strides = array<i32>} : memref<1x4x1024xf32, #tpu.memory_space<vmem>>, vector<1x1x1024xf32>,
    %c0_27 = arith.constant 0 : index
    %c2_28 = arith.constant 2 : index
    %c0_29 = arith.constant 0 : index
    %42 = vector.load %arg9[%c0_27, %c2_28, %c0_29] : memref<1x4x1024xf32, #tpu.memory_space<vmem>>, vector<1x1x1024xf32>
    tpu.vector_store %arg9[%c0_27, %c2_28, %c0_29], %35 {strides = array<i32>} : memref<1x4x1024xf32, #tpu.memory_space<vmem>>, vector<1x1x1024xf32>,
    %c0_30 = arith.constant 0 : index
    %c3_31 = arith.constant 3 : index
    %c0_32 = arith.constant 0 : index
    %43 = vector.load %arg9[%c0_30, %c3_31, %c0_32] : memref<1x4x1024xf32, #tpu.memory_space<vmem>>, vector<1x1x1024xf32>
    tpu.vector_store %arg9[%c0_30, %c3_31, %c0_32], %31 {strides = array<i32>} : memref<1x4x1024xf32, #tpu.memory_space<vmem>>, vector<1x1x1024xf32>,
    %c0_33 = arith.constant 0 : index
    %c0_34 = arith.constant 0 : index
    %c0_35 = arith.constant 0 : index
    %44 = vector.load %arg5[%c0_33, %c0_34, %c0_35] : memref<1x1x1024xf32, #tpu.memory_space<vmem>>, vector<1x1x1024xf32>
    %c0_36 = arith.constant 0 : index
    %c0_37 = arith.constant 0 : index
    %c0_38 = arith.constant 0 : index
    %45 = vector.load %arg10[%c0_36, %c0_37, %c0_38] : memref<1x1x1024xf32, #tpu.memory_space<vmem>>, vector<1x1x1024xf32>
    tpu.vector_store %arg10[%c0_36, %c0_37, %c0_38], %44 {strides = array<i32>} : memref<1x1x1024xf32, #tpu.memory_space<vmem>>, vector<1x1x1024xf32>,
    %c0_39 = arith.constant 0 : index
    %c0_40 = arith.constant 0 : index
    %c0_41 = arith.constant 0 : index
    %46 = vector.load %arg6[%c0_39, %c0_40, %c0_41] : memref<1x10x1024xf32, #tpu.memory_space<vmem>>, vector<1x10x1024xf32>
    %47 = vector.extract_strided_slice %46 {offsets = [0, 0, 0], sizes = [1, 2, 1024], strides = [1, 1, 1]} : vector<1x10x1024xf32> to vector<1x2x1024xf32>
    %cst_42 = arith.constant 1.000000e-01 : f32
    %48 = vector.broadcast %cst_42 : f32 to vector<1x2x1024xf32>
    %49 = arith.mulf %47, %48 : vector<1x2x1024xf32>
    %50 = arith.mulf %49, %3 : vector<1x2x1024xf32>
    %51 = arith.addf %2, %50 : vector<1x2x1024xf32>
    %52 = vector.extract_strided_slice %51 {offsets = [0, 0, 0], sizes = [1, 1, 1024], strides = [1, 1, 1]} : vector<1x2x1024xf32> to vector<1x1x1024xf32>
    %c0_43 = arith.constant 0 : index
    %53 = memref.load %arg3[%c0_43] : memref<10xf32, #tpu.memory_space<smem>>
    %54 = vector.broadcast %53 : f32 to vector<1x1x1024xf32>
    %55 = arith.mulf %52, %54 : vector<1x1x1024xf32>
    %c0_44 = arith.constant 0 : index
    %c0_45 = arith.constant 0 : index
    %c0_46 = arith.constant 0 : index
    %56 = vector.load %arg11[%c0_44, %c0_45, %c0_46] : memref<1x10x1024xf32, #tpu.memory_space<vmem>>, vector<1x1x1024xf32>
    tpu.vector_store %arg11[%c0_44, %c0_45, %c0_46], %55 {strides = array<i32>} : memref<1x10x1024xf32, #tpu.memory_space<vmem>>, vector<1x1x1024xf32>,
    %57 = vector.extract_strided_slice %51 {offsets = [0, 1, 0], sizes = [1, 1, 1024], strides = [1, 1, 1]} : vector<1x2x1024xf32> to vector<1x1x1024xf32>
    %c1_47 = arith.constant 1 : index
    %58 = memref.load %arg3[%c1_47] : memref<10xf32, #tpu.memory_space<smem>>
    %59 = vector.broadcast %58 : f32 to vector<1x1x1024xf32>
    %60 = arith.mulf %57, %59 : vector<1x1x1024xf32>
    %c0_48 = arith.constant 0 : index
    %c1_49 = arith.constant 1 : index
    %c0_50 = arith.constant 0 : index
    %61 = vector.load %arg11[%c0_48, %c1_49, %c0_50] : memref<1x10x1024xf32, #tpu.memory_space<vmem>>, vector<1x1x1024xf32>
    tpu.vector_store %arg11[%c0_48, %c1_49, %c0_50], %60 {strides = array<i32>} : memref<1x10x1024xf32, #tpu.memory_space<vmem>>, vector<1x1x1024xf32>,
    %62 = vector.extract_strided_slice %46 {offsets = [0, 2, 0], sizes = [1, 2, 1024], strides = [1, 1, 1]} : vector<1x10x1024xf32> to vector<1x2x1024xf32>
    %cst_51 = arith.constant 1.000000e-01 : f32
    %63 = vector.broadcast %cst_51 : f32 to vector<1x2x1024xf32>
    %64 = arith.mulf %62, %63 : vector<1x2x1024xf32>
    %65 = arith.mulf %64, %3 : vector<1x2x1024xf32>
    %66 = arith.addf %2, %65 : vector<1x2x1024xf32>
    %67 = vector.extract_strided_slice %66 {offsets = [0, 0, 0], sizes = [1, 1, 1024], strides = [1, 1, 1]} : vector<1x2x1024xf32> to vector<1x1x1024xf32>
    %c2_52 = arith.constant 2 : index
    %68 = memref.load %arg3[%c2_52] : memref<10xf32, #tpu.memory_space<smem>>
    %69 = vector.broadcast %68 : f32 to vector<1x1x1024xf32>
    %70 = arith.mulf %67, %69 : vector<1x1x1024xf32>
    %c0_53 = arith.constant 0 : index
    %c2_54 = arith.constant 2 : index
    %c0_55 = arith.constant 0 : index
    %71 = vector.load %arg11[%c0_53, %c2_54, %c0_55] : memref<1x10x1024xf32, #tpu.memory_space<vmem>>, vector<1x1x1024xf32>
    tpu.vector_store %arg11[%c0_53, %c2_54, %c0_55], %70 {strides = array<i32>} : memref<1x10x1024xf32, #tpu.memory_space<vmem>>, vector<1x1x1024xf32>,
    %72 = vector.extract_strided_slice %66 {offsets = [0, 1, 0], sizes = [1, 1, 1024], strides = [1, 1, 1]} : vector<1x2x1024xf32> to vector<1x1x1024xf32>
    %c3_56 = arith.constant 3 : index
    %73 = memref.load %arg3[%c3_56] : memref<10xf32, #tpu.memory_space<smem>>
    %74 = vector.broadcast %73 : f32 to vector<1x1x1024xf32>
    %75 = arith.mulf %72, %74 : vector<1x1x1024xf32>
    %c0_57 = arith.constant 0 : index
    %c3_58 = arith.constant 3 : index
    %c0_59 = arith.constant 0 : index
    %76 = vector.load %arg11[%c0_57, %c3_58, %c0_59] : memref<1x10x1024xf32, #tpu.memory_space<vmem>>, vector<1x1x1024xf32>
    tpu.vector_store %arg11[%c0_57, %c3_58, %c0_59], %75 {strides = array<i32>} : memref<1x10x1024xf32, #tpu.memory_space<vmem>>, vector<1x1x1024xf32>,
    %77 = vector.extract_strided_slice %46 {offsets = [0, 4, 0], sizes = [1, 2, 1024], strides = [1, 1, 1]} : vector<1x10x1024xf32> to vector<1x2x1024xf32>
    %cst_60 = arith.constant 1.000000e-01 : f32
    %78 = vector.broadcast %cst_60 : f32 to vector<1x2x1024xf32>
    %79 = arith.mulf %77, %78 : vector<1x2x1024xf32>
    %80 = arith.mulf %79, %3 : vector<1x2x1024xf32>
    %81 = arith.addf %2, %80 : vector<1x2x1024xf32>
    %82 = vector.extract_strided_slice %81 {offsets = [0, 0, 0], sizes = [1, 1, 1024], strides = [1, 1, 1]} : vector<1x2x1024xf32> to vector<1x1x1024xf32>
    %c4 = arith.constant 4 : index
    %83 = memref.load %arg3[%c4] : memref<10xf32, #tpu.memory_space<smem>>
    %84 = vector.broadcast %83 : f32 to vector<1x1x1024xf32>
    %85 = arith.mulf %82, %84 : vector<1x1x1024xf32>
    %c0_61 = arith.constant 0 : index
    %c4_62 = arith.constant 4 : index
    %c0_63 = arith.constant 0 : index
    %86 = vector.load %arg11[%c0_61, %c4_62, %c0_63] : memref<1x10x1024xf32, #tpu.memory_space<vmem>>, vector<1x1x1024xf32>
    tpu.vector_store %arg11[%c0_61, %c4_62, %c0_63], %85 {strides = array<i32>} : memref<1x10x1024xf32, #tpu.memory_space<vmem>>, vector<1x1x1024xf32>,
    %87 = vector.extract_strided_slice %81 {offsets = [0, 1, 0], sizes = [1, 1, 1024], strides = [1, 1, 1]} : vector<1x2x1024xf32> to vector<1x1x1024xf32>
    %c5 = arith.constant 5 : index
    %88 = memref.load %arg3[%c5] : memref<10xf32, #tpu.memory_space<smem>>
    %89 = vector.broadcast %88 : f32 to vector<1x1x1024xf32>
    %90 = arith.mulf %87, %89 : vector<1x1x1024xf32>
    %c0_64 = arith.constant 0 : index
    %c5_65 = arith.constant 5 : index
    %c0_66 = arith.constant 0 : index
    %91 = vector.load %arg11[%c0_64, %c5_65, %c0_66] : memref<1x10x1024xf32, #tpu.memory_space<vmem>>, vector<1x1x1024xf32>
    tpu.vector_store %arg11[%c0_64, %c5_65, %c0_66], %90 {strides = array<i32>} : memref<1x10x1024xf32, #tpu.memory_space<vmem>>, vector<1x1x1024xf32>,
    %92 = vector.extract_strided_slice %46 {offsets = [0, 6, 0], sizes = [1, 2, 1024], strides = [1, 1, 1]} : vector<1x10x1024xf32> to vector<1x2x1024xf32>
    %cst_67 = arith.constant 1.000000e-01 : f32
    %93 = vector.broadcast %cst_67 : f32 to vector<1x2x1024xf32>
    %94 = arith.mulf %92, %93 : vector<1x2x1024xf32>
    %95 = arith.mulf %94, %3 : vector<1x2x1024xf32>
    %96 = arith.addf %2, %95 : vector<1x2x1024xf32>
    %97 = vector.extract_strided_slice %96 {offsets = [0, 0, 0], sizes = [1, 1, 1024], strides = [1, 1, 1]} : vector<1x2x1024xf32> to vector<1x1x1024xf32>
    %c6 = arith.constant 6 : index
    %98 = memref.load %arg3[%c6] : memref<10xf32, #tpu.memory_space<smem>>
    %99 = vector.broadcast %98 : f32 to vector<1x1x1024xf32>
    %100 = arith.mulf %97, %99 : vector<1x1x1024xf32>
    %c0_68 = arith.constant 0 : index
    %c6_69 = arith.constant 6 : index
    %c0_70 = arith.constant 0 : index
    %101 = vector.load %arg11[%c0_68, %c6_69, %c0_70] : memref<1x10x1024xf32, #tpu.memory_space<vmem>>, vector<1x1x1024xf32>
    tpu.vector_store %arg11[%c0_68, %c6_69, %c0_70], %100 {strides = array<i32>} : memref<1x10x1024xf32, #tpu.memory_space<vmem>>, vector<1x1x1024xf32>,
    %102 = vector.extract_strided_slice %96 {offsets = [0, 1, 0], sizes = [1, 1, 1024], strides = [1, 1, 1]} : vector<1x2x1024xf32> to vector<1x1x1024xf32>
    %c7 = arith.constant 7 : index
    %103 = memref.load %arg3[%c7] : memref<10xf32, #tpu.memory_space<smem>>
    %104 = vector.broadcast %103 : f32 to vector<1x1x1024xf32>
    %105 = arith.mulf %102, %104 : vector<1x1x1024xf32>
    %c0_71 = arith.constant 0 : index
    %c7_72 = arith.constant 7 : index
    %c0_73 = arith.constant 0 : index
    %106 = vector.load %arg11[%c0_71, %c7_72, %c0_73] : memref<1x10x1024xf32, #tpu.memory_space<vmem>>, vector<1x1x1024xf32>
    tpu.vector_store %arg11[%c0_71, %c7_72, %c0_73], %105 {strides = array<i32>} : memref<1x10x1024xf32, #tpu.memory_space<vmem>>, vector<1x1x1024xf32>,
    %107 = vector.extract_strided_slice %46 {offsets = [0, 8, 0], sizes = [1, 2, 1024], strides = [1, 1, 1]} : vector<1x10x1024xf32> to vector<1x2x1024xf32>
    %cst_74 = arith.constant 1.000000e-01 : f32
    %108 = vector.broadcast %cst_74 : f32 to vector<1x2x1024xf32>
    %109 = arith.mulf %107, %108 : vector<1x2x1024xf32>
    %110 = arith.mulf %109, %3 : vector<1x2x1024xf32>
    %111 = arith.addf %2, %110 : vector<1x2x1024xf32>
    %112 = vector.extract_strided_slice %111 {offsets = [0, 0, 0], sizes = [1, 1, 1024], strides = [1, 1, 1]} : vector<1x2x1024xf32> to vector<1x1x1024xf32>
    %c8 = arith.constant 8 : index
    %113 = memref.load %arg3[%c8] : memref<10xf32, #tpu.memory_space<smem>>
    %114 = vector.broadcast %113 : f32 to vector<1x1x1024xf32>
    %115 = arith.mulf %112, %114 : vector<1x1x1024xf32>
    %c0_75 = arith.constant 0 : index
    %c8_76 = arith.constant 8 : index
    %c0_77 = arith.constant 0 : index
    %116 = vector.load %arg11[%c0_75, %c8_76, %c0_77] : memref<1x10x1024xf32, #tpu.memory_space<vmem>>, vector<1x1x1024xf32>
    tpu.vector_store %arg11[%c0_75, %c8_76, %c0_77], %115 {strides = array<i32>} : memref<1x10x1024xf32, #tpu.memory_space<vmem>>, vector<1x1x1024xf32>,
    %117 = vector.extract_strided_slice %111 {offsets = [0, 1, 0], sizes = [1, 1, 1024], strides = [1, 1, 1]} : vector<1x2x1024xf32> to vector<1x1x1024xf32>
    %c9 = arith.constant 9 : index
    %118 = memref.load %arg3[%c9] : memref<10xf32, #tpu.memory_space<smem>>
    %119 = vector.broadcast %118 : f32 to vector<1x1x1024xf32>
    %120 = arith.mulf %117, %119 : vector<1x1x1024xf32>
    %c0_78 = arith.constant 0 : index
    %c9_79 = arith.constant 9 : index
    %c0_80 = arith.constant 0 : index
    %121 = vector.load %arg11[%c0_78, %c9_79, %c0_80] : memref<1x10x1024xf32, #tpu.memory_space<vmem>>, vector<1x1x1024xf32>
    tpu.vector_store %arg11[%c0_78, %c9_79, %c0_80], %120 {strides = array<i32>} : memref<1x10x1024xf32, #tpu.memory_space<vmem>>, vector<1x1x1024xf32>,
    return
  }
  func.func @transform_0(%arg0: i32, %arg1: i32, %arg2: memref<4xf32, #tpu.memory_space<smem>>, %arg3: memref<10xf32, #tpu.memory_space<smem>>) -> (i32, i32, i32) {
    %c0_i32 = arith.constant 0 : i32
    %c0_i32_0 = arith.constant 0 : i32
    return %arg1, %c0_i32, %arg0 : i32, i32, i32
  }
  func.func @transform_1(%arg0: i32, %arg1: i32, %arg2: memref<4xf32, #tpu.memory_space<smem>>, %arg3: memref<10xf32, #tpu.memory_space<smem>>) -> (i32, i32, i32) {
    %c0_i32 = arith.constant 0 : i32
    %c0_i32_0 = arith.constant 0 : i32
    return %arg1, %c0_i32, %arg0 : i32, i32, i32
  }
  func.func @transform_2(%arg0: i32, %arg1: i32, %arg2: memref<4xf32, #tpu.memory_space<smem>>, %arg3: memref<10xf32, #tpu.memory_space<smem>>) -> (i32, i32, i32) {
    %c0_i32 = arith.constant 0 : i32
    %c0_i32_0 = arith.constant 0 : i32
    return %arg1, %c0_i32, %arg0 : i32, i32, i32
  }
  func.func @transform_3(%arg0: i32, %arg1: i32, %arg2: memref<4xf32, #tpu.memory_space<smem>>, %arg3: memref<10xf32, #tpu.memory_space<smem>>) -> (i32, i32, i32) {
    %c0_i32 = arith.constant 0 : i32
    %c0_i32_0 = arith.constant 0 : i32
    %c0_i32_1 = arith.constant 0 : i32
    return %c0_i32, %c0_i32_0, %arg0 : i32, i32, i32
  }
  func.func @transform_4(%arg0: i32, %arg1: i32, %arg2: memref<4xf32, #tpu.memory_space<smem>>, %arg3: memref<10xf32, #tpu.memory_space<smem>>) -> (i32, i32, i32) {
    %c0_i32 = arith.constant 0 : i32
    %c0_i32_0 = arith.constant 0 : i32
    return %arg1, %c0_i32, %arg0 : i32, i32, i32
  }
  func.func @transform_5(%arg0: i32, %arg1: i32, %arg2: memref<4xf32, #tpu.memory_space<smem>>, %arg3: memref<10xf32, #tpu.memory_space<smem>>) -> (i32, i32, i32) {
    %c0_i32 = arith.constant 0 : i32
    %c0_i32_0 = arith.constant 0 : i32
    return %arg1, %c0_i32, %arg0 : i32, i32, i32
  }
  func.func @transform_6(%arg0: i32, %arg1: i32, %arg2: memref<4xf32, #tpu.memory_space<smem>>, %arg3: memref<10xf32, #tpu.memory_space<smem>>) -> (i32, i32, i32) {
    %c0_i32 = arith.constant 0 : i32
    %c0_i32_0 = arith.constant 0 : i32
    return %arg1, %c0_i32, %arg0 : i32, i32, i32
  }
  func.func @transform_7(%arg0: i32, %arg1: i32, %arg2: memref<4xf32, #tpu.memory_space<smem>>, %arg3: memref<10xf32, #tpu.memory_space<smem>>) -> (i32, i32, i32) {
    %c0_i32 = arith.constant 0 : i32
    %c0_i32_0 = arith.constant 0 : i32
    return %arg1, %c0_i32, %arg0 : i32, i32, i32
  }
}

</mosaic_0001>

<bundles_post_ra>
// kernel: tpu_custom_call.1
= control target key start
LH: loop header
LB: loop body
LE: loop exit
PB: predicated region body
PF: predicated region fallthrough
CT: control target
= control target key end

     0   :  { %s3012_s0 = inlined_call_operand.vmem [shape: f32[4], index: 0, kind: input, shape index: {}]   ;;  %s3013_s2 = inlined_call_operand.vmem [shape: f32[2,4,1024], index: 2, kind: input, shape index: {}]   ;;  %s3014_s3 = inlined_call_operand.vmem [shape: f32[2,1,1024], index: 3, kind: input, shape index: {}]   ;;  %s3015_s4 = inlined_call_operand.vmem [shape: f32[2,10,1024], index: 4, kind: input, shape index: {}]   ;;  %s3016_s5 = inlined_call_operand.vmem [shape: f32[1,4,1024], index: 5, kind: input, shape index: {}]   ;;  %s3017_s6 = inlined_call_operand.hbm [shape: f32[2,4,1024], index: 6, kind: output, shape index: {0}]   ;;  %s3018_s7 = inlined_call_operand.hbm [shape: f32[2,4,1024], index: 7, kind: output, shape index: {1}]   ;;  %s3019_s8 = inlined_call_operand.hbm [shape: f32[2,1,1024], index: 8, kind: output, shape index: {2}]   ;;  %s3020_s9 = inlined_call_operand.vmem [shape: f32[2,10,1024], index: 9, kind: output, shape index: {3}]   ;;  %s3021_s1 = inlined_call_operand.vmem [shape: f32[10], index: 1, kind: input, shape index: {}]  }
   0x1   :  { %3034 = sst [smem:[#allocation14_spill]] %s3013_s2  ;;  %s15_s11 = sshll.u32 %s3012_s0, 4  ;;  %s16_s11 = int_to_ptr.vmem [resolvable:$true] %s15_s11 }
   0x2   :  { %3035 = sst [smem:[#allocation15_spill]] %s3014_s3  ;;  %s19_s14 = sshll.u32 %s3021_s1, 4  ;;  %s20_s14 = int_to_ptr.vmem [resolvable:$true] %s19_s14 }
   0x3   :  { %3036 = sst [smem:[#allocation16_spill]] %s3015_s4  ;;  %s2052_s15 = scalar_lea.vmem %s16_s11, 16 }
   0x4   :  { %3037 = sst [smem:[#allocation17_spill]] %s3016_s5  ;;  %p2053_p0 = scmp.ne.s32.totalorder %s16_s11, %s2052_s15 }
   0x5   :  { %3038 = sst [smem:[#allocation18_spill]] %s3020_s9  ;;  %p2057_p1 = scmp.lt.s32.totalorder %s16_s11, %s16_s11 }
   0x6   :  { %p2058_p2 = scmp.lt.s32.totalorder %s2052_s15, %s2052_s15 }
   0x8   :  { %p2059_p3 = por %p2058_p2, %p2057_p1 }
   0xa   :  { %p2060_p4 = pnand %p2059_p3, %p2053_p0 }
   0xc   :  { %2063 = shalt.err (!%p2060_p4)  }
   0xd   :  { %s2218_s16 = smov [#allocation3]   ;;  %s2064_s17 = scalar_lea.vmem %s20_s14, 16 }
   0xe   :  { %18 = dma.vmem_to_smem %s16_s11, 16, %s2218_s16, [#allocation2] }
   0xf   :  { %p2065_p5 = scmp.ne.s32.totalorder %s20_s14, %s2064_s17  ;;  %p2069_p6 = scmp.lt.s32.totalorder %s20_s14, %s20_s14 }
  0x10   :  { %p2070_p7 = scmp.lt.s32.totalorder %s2064_s17, %s2064_s17 }
  0x12   :  { %p2071_p8 = por %p2070_p7, %p2069_p6 }
  0x14   :  { %p2072_p9 = pnand %p2071_p8, %p2065_p5 }
  0x16   :  { %2075 = shalt.err (!%p2072_p9)  }
  0x17   :  { %s2219_s0 = smov [#allocation4]  }
  0x18   :  { %22 = dma.vmem_to_smem %s20_s14, 16, %s2219_s0, [#allocation2] }
  0x19   :  { %2184 = dma.done.wait [#allocation2], 32 }
  0x1a   :  { %2185 = vsyncadd [#allocation2], 4294967264 }
  0x1b   :  { %24 = sfence }
  0x1c   :  { %25 = vsyncpa [#allocation6], 0 }
  0x1d   :  { %27 = vsyncpa [#allocation6 + $0x1], 0 }
  0x1e   :  { %28 = vsyncpa [#allocation8], 0 }
  0x1f   :  { %30 = vsyncpa [#allocation8 + $0x1], 0  ;;  %s2280_s1 = smov 0   ;;  %s2282_s18 = smov 0  }
  0x20   :  { %s2284_s19 = smov 0   ;;  %s2286_s20 = smov 0  }
  0x21   :  { %s2288_s21 = smov 0   ;;  %s2290_s22 = smov 0  }
  0x22 LB: > { %s3023_s23 = sadd.s32 4294967295, %s2216_s22   ;;  %s3022_s24 = sadd.s32 4294967294, %s2216_s22   ;;  %s2216_s22 = sphi %s2290_s22, %s36_s22   ;;  %s2212_s21 = sphi %s2288_s21, %s3069_s21   ;;  %s2208_s20 = sphi %s2286_s20, %s3068_s20   ;;  %s2204_s19 = sphi %s2284_s19, %s3067_s19   ;;  %s2200_s18 = sphi %s2282_s18, %s3066_s18   ;;  %s2196_s1 = sphi %s2280_s1, %s3065_s1  }
  0x23   : > { %s45_s25 = sadd.s32 1, %s2212_s21  ;;  %s167_s26 = sadd.s32 1, %s2204_s19 }
  0x24   : > { %p46_p10 = scmp.ge.s32.totalorder %s45_s25, 2  ;;  %p177_p11 = scmp.ne.s32.totalorder %s2204_s19, %s2200_s18 }
  0x25   : > { %p178_p12 = scmp.eq.s32.totalorder %s3023_s23, 1  ;;  %p183_p13 = scmp.ne.s32.totalorder %s2200_s18, %s2196_s1 }
  0x26   : > { %s3071_s25 = smov (%p46_p10, %s45_s25), 0  ;;  %p184_p1 = scmp.eq.s32.totalorder %s3022_s24, 1 }
  0x27   : > { %3039 = sst [smem:[#allocation13_spill]] %s3071_s25  ;;  %p2322_p0 = por %p178_p12, %p177_p11 }
  0x28   : > { %s162_s28 = ssub.s32 %s2212_s21, %s3071_s25  ;;  %p1904_p2 = scmp.ge.s32.totalorder %s2216_s22, 1 }
  0x29   : > { %p165_p3 = scmp.eq.s32.totalorder %s162_s28, 0  ;;  %p2331_p4 = por %p184_p1, %p183_p13 }
  0x2a   : > { %p333_p5 = scmp.lt.s32.totalorder %s2216_s22, 3 }
  0x2b   : > { %s2337_s30 = scalar_select %p165_p3, %s2204_s19, %s167_s26  }
  0x2c   : > { %p334_p6 = pnand %p1904_p2, %p333_p5 }
  0x2d   : > { %p411_p7 = scmp.lt.s32.totalorder (!%p334_p6), %s2208_s20, 1  ;;  %s3042_s5 = sld [smem:[#allocation17_spill]] (!%p334_p6)  ;;  %v569_v3 = vlaneseq (!%p334_p6)  ;;  %v2220_v13 = vmov (!%p334_p6), 1966171168  }
  0x2e   : > { %337 = sbr.rel (%p334_p6) target bundleno = 224 (0xe0), region = 36  ;;  %s2368_s0 = sld [smem:[#allocation3 + $0x1]] (!%p334_p6)  ;;  %v567_v14 = vunpack.c.l.s4 (!%p334_p6), %v2220_v13 }
  0x2f   : > { %s2386_s28 = sand.u32 (!%p334_p6), 1, %s2200_s18   ;;  %v570_v17 = vshrl.u32 (!%p334_p6), %v569_v3, 7  ;;  %s2392_s10 = sld [smem:[#allocation3]] (!%p334_p6) }
  0x30   : > { %v568_v20 = vunpack.c.0.s8 (!%p334_p6), %v567_v14  ;;  %s2401_s12 = sld [smem:[#allocation3 + $0x3]] (!%p334_p6)  ;;  %s3043_s2 = sld [smem:[#allocation14_spill]] (!%p334_p6) }
  0x31   : > { %s2415_s17 = sld [smem:[#allocation3 + $0x2]] (!%p334_p6)  ;;  %s3045_s3 = sld [smem:[#allocation15_spill]] (!%p334_p6) }
  0x32   : > { %v2413_v30 = vsub.s32 (!%p334_p6), %v568_v20, %v570_v17  ;;  %s3044_s4 = sld [smem:[#allocation16_spill]] (!%p334_p6)  ;;  %s3046_s9 = sld [smem:[#allocation18_spill]] (!%p334_p6) }
  0x33   : > { %v2343_v0 = vld [vmem:[%s3042_s5] sm:$0xff] (!%p334_p6)  ;;  %v2348_v1 = vld [vmem:[%s3042_s5 + $0x8] sm:$0xff] (!%p334_p6)  ;;  %v2353_v2 = vld [vmem:[%s3042_s5 + $0x10] sm:$0xff] (!%p334_p6) }
  0x34   : > { %v2358_v4 = vld [vmem:[%s3042_s5 + $0x18] sm:$0xff] (!%p334_p6)  ;;  %v474_v5 = vrot.slane (!%p334_p6), %v2343_v0, 6  ;;  %v476_v6 = vrot.slane (!%p334_p6), %v2348_v1, 6  ;;  %v478_v7 = vrot.slane (!%p334_p6), %v2353_v2, 6  ;;  %v2365_v8 = vcombine.high (!%p334_p6), %v2343_v0, %v2343_v0 }
  0x35   : > { %v3032_v9 = vrot.slane %v2358_v4, 6  ;;  %v2372_v10 = vcombine.high %v2348_v1, %v2348_v1  ;;  %v2376_v11 = vcombine.high %v2353_v2, %v2353_v2  ;;  %s2381_s26 = scalar_select %p411_p7, %s2208_s20, 1  ;;  %v2396_v18 = vcombine.high %v2358_v4, %v2358_v4 }
  0x36   : > { %v475_v12 = vrot.slane %v474_v5, 4  ;;  %v477_v15 = vrot.slane %v476_v6, 4  ;;  %v479_v16 = vrot.slane %v478_v7, 4  ;;  %v3031_v21 = vrot.slane %v2343_v0, 2 }
  0x37   : > { %s1970_s11 = sshll.u32 %s2381_s26, 5  ;;  %v481_v19 = vrot.slane %v3032_v9, 4  ;;  %v3030_v22 = vrot.slane %v2365_v8, 2  ;;  %s1971_s16 = sshll.u32 %s2381_s26, 7  ;;  %v3029_v23 = vrot.slane %v2348_v1, 2  ;;  %v3028_v24 = vrot.slane %v2372_v10, 2 }
  0x38   : > { %s418_s15 = scalar_lea.vmem %s3043_s2, %s1970_s11  ;;  %v3027_v25 = vrot.slane %v2353_v2, 2  ;;  %v3026_v26 = vrot.slane %v2376_v11, 2  ;;  %v3025_v31 = vrot.slane %v2358_v4, 2  ;;  %v3024_v36 = vrot.slane %v2396_v18, 2  ;;  %s2428_s14 = scalar_lea.vmem %s3044_s4, %s1971_s16 }
  0x39   : > { %v462_v27 = vld [vmem:[%s418_s15] sm:$0xff]  ;;  %v463_v28 = vld [vmem:[%s418_s15 + $0x8] sm:$0xff]  ;;  %v464_v29 = vld [vmem:[%s418_s15 + $0x10] sm:$0xff]  ;;  %s1910_s24 = sshll.u32 %s2381_s26, 3  ;;  %v2438_v52 = vstv %s2368_s0  ;;  %s1924_s0 = sld [smem:[#allocation4 + $0x1]] }
  0x3a   : > { %v465_v33 = vld [vmem:[%s418_s15 + $0x18] sm:$0xff]  ;;  %v466_v34 = vmul.f32 0.1, %v462_v27  ;;  %v467_v35 = vmul.f32 0.1, %v463_v28  ;;  %s1907_s15 = sshll.u32 %s2386_s28, 3  ;;  %s427_s23 = scalar_lea.vmem %s3045_s3, %s1910_s24  ;;  %v2459_v63 = vstv %s2392_s10  ;;  %v2462_v3 = vstv %s2401_s12 }
  0x3b   : > { %v468_v38 = vmul.f32 0.1, %v464_v29  ;;  %v469_v39 = vmul.f32 0.1, %v465_v33  ;;  %v494_v40 = vmul.f32 0.2, %v462_v27  ;;  %v2469_v14 = vstv %s2415_s17  ;;  %s2630_s13 = scalar_lea.vmem %s3046_s9, %s1971_s16 }
  0x3c   : > { %v486_v42 = vmul.f32 %v475_v12, %v466_v34  ;;  %v487_v43 = vmul.f32 %v477_v15, %v467_v35  ;;  %v495_v44 = vmul.f32 0.2, %v463_v28  ;;  %v496_v45 = vmul.f32 0.2, %v464_v29  ;;  %v776_v53 = vld [vmem:[%s427_s23] sm:$0xff]  ;;  %s2449_s24 = scalar_lea.vmem [#allocation9], %s1907_s15 }
  0x3d   : > { %v488_v46 = vmul.f32 %v479_v16, %v468_v38  ;;  %v489_v47 = vmul.f32 %v481_v19, %v469_v39  ;;  %v497_v48 = vmul.f32 0.2, %v465_v33  ;;  %v498_v49 = vmul.f32 1.442695, %v494_v40  ;;  %v778_v54 = vld [vmem:[%s2428_s14] sm:$0xff]  ;;  %777 = vst [vmem:[%s2449_s24] sm:$0xff] %v776_v53  ;;  %v779_v59 = vld [vmem:[%s2428_s14 + $0x8] sm:$0xff] }
  0x3e   : > { %v500_v50 = vmul.f32 1.442695, %v495_v44  ;;  %v502_v51 = vmul.f32 1.442695, %v496_v45  ;;  %v2444_v56 = vadd.f32 %v486_v42, %v2343_v0  ;;  %v2447_v57 = vadd.f32 %v487_v43, %v2348_v1  ;;  %v780_v60 = vld [vmem:[%s2428_s14 + $0x10] sm:$0xff]  ;;  %v781_v61 = vld [vmem:[%s2428_s14 + $0x18] sm:$0xff] }
  0x3f   : > { %2044 = vpow2.f32 %v498_v49  ;;  %v504_v58 = vmul.f32 1.442695, %v497_v48  ;;  %v2456_v62 = vadd.f32 %v488_v46, %v2353_v2  ;;  %v782_v12 = vld [vmem:[%s2428_s14 + $0x20] sm:$0xff]  ;;  %v2466_v13 = vadd.f32 %v489_v47, %v2358_v4  ;;  %v783_v15 = vld [vmem:[%s2428_s14 + $0x28] sm:$0xff]  ;;  %v784_v16 = vld [vmem:[%s2428_s14 + $0x30] sm:$0xff]  ;;  %s850_s23 = sld [smem:[#allocation4]] }
  0x40   : > { %2046 = vpow2.f32 %v500_v50  ;;  %v785_v17 = vld [vmem:[%s2428_s14 + $0x38] sm:$0xff]  ;;  %v2474_v19 = vmul.f32 0.1, %v778_v54  ;;  %v2476_v20 = vmul.f32 0.1, %v779_v59  ;;  %s1905_s10 = sshll.u32 %s2386_s28, 5 }
  0x41   : > { %2048 = vpow2.f32 %v502_v51  ;;  %v2478_v27 = vmul.f32 0.1, %v780_v60  ;;  %v2480_v28 = vmul.f32 0.1, %v781_v61  ;;  %v2482_v29 = vmul.f32 0.1, %v782_v12 }
  0x42   : > { %2050 = vpow2.f32 %v504_v58  ;;  %v2484_v33 = vmul.f32 0.1, %v783_v15  ;;  %v2486_v34 = vmul.f32 0.1, %v784_v16  ;;  %v822_v35 = vmul.f32 %v3031_v21, %v2474_v19  ;;  %s2618_s12 = sld [smem:[#allocation4 + $0x2]]  ;;  %s2623_s17 = sld [smem:[#allocation4 + $0x3]] }
  0x43   : > { %v2491_v38 = vmul.f32 0.1, %v785_v17  ;;  %v823_v39 = vmul.f32 %v3030_v22, %v2476_v20  ;;  %v824_v40 = vmul.f32 %v3029_v23, %v2478_v27  ;;  %v825_v42 = vmul.f32 %v3028_v24, %v2480_v28  ;;  %s2644_s26 = scalar_lea.vmem [#allocation7], %s1905_s10  ;;  %s2650_s16 = scalar_lea.vmem [#allocation5], %s1905_s10 }
  0x44   : > { %v826_v43 = vmul.f32 %v3027_v25, %v2482_v29  ;;  %v827_v44 = vmul.f32 %v3026_v26, %v2484_v33  ;;  %v828_v45 = vmul.f32 %v3025_v31, %v2486_v34  ;;  %v2513_v46 = vmul.f32 %v2474_v19, %v2343_v0  ;;  %s1973_s10 = sshll.u32 %s2208_s20, 9  ;;  %s1651_s15 = sshll.u32 %s2644_s26, 4  ;;  %s2697_s15 = int_to_ptr.vmem [resolvable:$true] %s1651_s15 }
  0x45   : > { %v829_v47 = vmul.f32 %v3024_v36, %v2491_v38  ;;  %v838_v48 = vcombine.low %v822_v35, %v823_v39  ;;  %v839_v49 = vcombine.low %v824_v40, %v825_v42  ;;  %v2520_v50 = vmul.f32 %v2365_v8, %v2476_v20  ;;  %s1635_s11 = sshll.u32 %s2650_s16, 4  ;;  %s2691_s3 = scalar_lea.hbm %s3018_s7, %s1973_s10  ;;  %s2716_s11 = int_to_ptr.vmem [resolvable:$true] %s1635_s11 }
  0x46   : > { %v840_v51 = vcombine.low %v826_v43, %v827_v44  ;;  %v2524_v53 = vmul.f32 %v2478_v27, %v2348_v1  ;;  %v2528_v54 = vmul.f32 %v2372_v10, %v2480_v28  ;;  %v2532_v58 = vmul.f32 %v2482_v29, %v2353_v2  ;;  %s1975_s4 = sshll.u32 %s2208_s20, 7  ;;  %s2707_s5 = scalar_lea.hbm %s3017_s6, %s1973_s10 }
  0x47   : > { %v841_v59 = vcombine.low %v828_v45, %v829_v47  ;;  %v846_v60 = vadd.f32 %v838_v48, %v2343_v0  ;;  %v847_v61 = vadd.f32 %v839_v49, %v2348_v1  ;;  %v2538_v12 = vmul.f32 %v2376_v11, %v2484_v33  ;;  %s2728_s20 = sld [smem:[#allocation4 + $0x5]]  ;;  %s2733_s2 = scalar_lea.hbm %s3019_s8, %s1975_s4 }
  0x48   : > { %v848_v16 = vadd.f32 %v840_v51, %v2353_v2  ;;  %v2543_v17 = vmul.f32 %v2486_v34, %v2358_v4  ;;  %v2547_v35 = vmul.f32 %v2396_v18, %v2491_v38  ;;  %v987_v39 = vcombine.low %v2513_v46, %v2520_v50  ;;  %s2076_s9 = scalar_lea.vmem %s2697_s15, 512 }
  0x49   : > { %v2045_v15 = vpop.eup %2044  ;;  %v849_v43 = vadd.f32 %v841_v59, %v2358_v4  ;;  %v851_v44 = vstv %s850_s23  ;;  %v909_v45 = vstv %s1924_s0  ;;  %s1667_s23 = sshll.u32 %s2449_s24, 4  ;;  %s3047_s24 = sadd.s32 4294967295, %s2216_s22   ;;  %s2673_s23 = int_to_ptr.vmem [resolvable:$true] %s1667_s23 }
  0x4a   : > { %v2047_v40 = vpop.eup %2046  ;;  %v506_v42 = vmul.f32 %v2045_v15, %v2343_v0  ;;  %v852_v49 = vmul.f32 %v851_v44, %v846_v60  ;;  %v853_v51 = vmul.f32 %v851_v44, %v847_v61  ;;  %v854_v36 = vmul.f32 %v851_v44, %v848_v16  ;;  %s2656_s0 = sand.u32 1, %s3047_s24   ;;  %p2077_p8 = scmp.ne.s32.totalorder %s2697_s15, %s2076_s9 }
  0x4b   : > { %v2049_v47 = vpop.eup %2048  ;;  %v507_v48 = vmul.f32 %v2047_v40, %v2348_v1  ;;  %v855_v24 = vmul.f32 %v851_v44, %v849_v43  ;;  %v2555_v23 = vmul.f32 %v909_v45, %v846_v60 }
  0x4c   : > { %v2051_v31 = vpop.eup %2050  ;;  %v508_v26 = vmul.f32 %v2049_v47, %v2353_v2  ;;  %v510_v25 = vmul.f32 0.5, %v506_v42  ;;  %v866_v59 = vrot.slane %v852_v49, %v2413_v30  ;;  %v873_v21 = vrot.slane %v853_v51, %v2413_v30  ;;  %p2078_p9 = pnand %p2077_p8, %p2322_p0 }
  0x4d   : > { %v509_v22 = vmul.f32 %v2051_v31, %v2358_v4  ;;  %v511_v15 = vmul.f32 0.5, %v507_v48  ;;  %v880_v40 = vrot.slane %v854_v36, %v2413_v30  ;;  %v887_v37 = vrot.slane %v855_v24, %v2413_v30 }
  0x4e   : > { %v512_v55 = vmul.f32 0.5, %v508_v26  ;;  %v518_v41 = vrot.slane %v510_v25, 6  ;;  %v2562_v47 = vcombine.low %v866_v59, %v873_v21  ;;  %v2564_v42 = vmul.f32 %v909_v45, %v847_v61  ;;  %p2079_p10 = pneg %p2078_p9 }
  0x4f   : > { %v513_v32 = vmul.f32 0.5, %v509_v22  ;;  %v520_v9 = vrot.slane %v511_v15, 6  ;;  %v2566_v31 = vcombine.low %v880_v40, %v887_v37  ;;  %v2568_v48 = vmul.f32 %v909_v45, %v848_v16 }
  0x50   : > { %v519_v60 = vrot.slane %v518_v41, 4  ;;  %v522_v44 = vrot.slane %v512_v55, 6  ;;  %v896_v25 = vrot.slane %v2562_v47, %v2413_v30  ;;  %v2572_v26 = vmul.f32 %v909_v45, %v849_v43 }
  0x51   : > { %v521_v49 = vrot.slane %v520_v9, 4  ;;  %v524_v51 = vrot.slane %v513_v32, 6  ;;  %v903_v36 = vrot.slane %v2566_v31, %v2413_v30  ;;  %v924_v9 = vrot.slane %v2555_v23, %v2413_v30 }
  0x52   : > { %v523_v24 = vrot.slane %v522_v44, 4  ;;  %v530_v22 = vsub.f32 %v2444_v56, %v519_v60  ;;  %v534_v21 = vadd.f32 %v519_v60, %v2444_v56  ;;  %v938_v47 = vrot.slane %v2568_v48, %v2413_v30 }
  0x53   : > { %v525_v41 = vrot.slane %v524_v51, 4  ;;  %v531_v37 = vsub.f32 %v2447_v57, %v521_v49  ;;  %v535_v55 = vadd.f32 %v521_v49, %v2447_v57  ;;  %v989_v48 = vcombine.low %v2532_v58, %v2538_v12 }
  0x54   : > { %v532_v32 = vsub.f32 %v2456_v62, %v523_v24  ;;  %v546_v61 = vmul.f32 %v2438_v52, %v530_v22  ;;  %v540_v16 = vmul.f32 %v2459_v63, %v530_v22  ;;  %v536_v43 = vadd.f32 %v523_v24, %v2456_v62 }
  0x55   : > { %v533_v56 = vsub.f32 %v2466_v13, %v525_v41  ;;  %v547_v45 = vmul.f32 %v2438_v52, %v531_v37  ;;  %v541_v15 = vmul.f32 %v2459_v63, %v531_v37  ;;  %v537_v59 = vadd.f32 %v525_v41, %v2466_v13 }
  0x56   : > { %v548_v57 = vmul.f32 %v2438_v52, %v532_v32  ;;  %v623_v40 = vrot.slane %v546_v61, %v2413_v30  ;;  %v542_v60 = vmul.f32 %v2459_v63, %v532_v32  ;;  %v572_v44 = vrot.slane %v540_v16, %v2413_v30 }
  0x57   : > { %v549_v31 = vmul.f32 %v2438_v52, %v533_v56  ;;  %v630_v62 = vrot.slane %v547_v45, %v2413_v30  ;;  %v543_v49 = vmul.f32 %v2459_v63, %v533_v56  ;;  %v579_v51 = vrot.slane %v541_v15, %v2413_v30 }
  0x58   : > { %v637_v24 = vrot.slane %v548_v57, %v2413_v30  ;;  %v586_v13 = vrot.slane %v542_v60, %v2413_v30  ;;  %v558_v22 = vmul.f32 %v2462_v3, %v534_v21  ;;  %v559_v41 = vmul.f32 %v2462_v3, %v535_v55 }
  0x59   : > { %v644_v37 = vrot.slane %v549_v31, %v2413_v30  ;;  %v645_v32 = vcombine.high %v623_v40, %v630_v62  ;;  %v593_v61 = vrot.slane %v543_v49, %v2413_v30  ;;  %v594_v52 = vcombine.low %v572_v44, %v579_v51 }
  0x5a   : > { %v560_v16 = vmul.f32 %v2462_v3, %v536_v43  ;;  %v561_v63 = vmul.f32 %v2462_v3, %v537_v59  ;;  %v727_v56 = vrot.slane %v558_v22, %v2413_v30  ;;  %v734_v45 = vrot.slane %v559_v41, %v2413_v30 }
  0x5b   : > { %v646_v15 = vcombine.high %v637_v24, %v644_v37  ;;  %v653_v57 = vrot.slane %v645_v32, %v2413_v30  ;;  %v595_v60 = vcombine.low %v586_v13, %v593_v61  ;;  %v602_v31 = vrot.slane %v594_v52, %v2413_v30 }
  0x5c   : > { %v741_v40 = vrot.slane %v560_v16, %v2413_v30  ;;  %v748_v44 = vrot.slane %v561_v63, %v2413_v30  ;;  %v749_v62 = vcombine.high %v727_v56, %v734_v45  ;;  %v552_v49 = vmul.f32 %v2469_v14, %v534_v21 }
  0x5d   : > { %v660_v3 = vrot.slane %v646_v15, %v2413_v30  ;;  %v609_v51 = vrot.slane %v595_v60, %v2413_v30  ;;  %v553_v24 = vmul.f32 %v2469_v14, %v535_v55  ;;  %v554_v22 = vmul.f32 %v2469_v14, %v536_v43 }
  0x5e   : > { %v750_v13 = vcombine.high %v741_v40, %v748_v44  ;;  %v757_v41 = vrot.slane %v749_v62, %v2413_v30  ;;  %v555_v37 = vmul.f32 %v2469_v14, %v537_v59  ;;  %v675_v32 = vrot.slane %v552_v49, %v2413_v30 }
  0x5f   : > { %v661_v21 = vcombine.low %v653_v57, %v660_v3  ;;  %v610_v55 = vcombine.low %v602_v31, %v609_v51  ;;  %v682_v43 = vrot.slane %v553_v24, %v2413_v30  ;;  %v689_v61 = vrot.slane %v554_v22, %v2413_v30 }
  0x60   : > { %v764_v14 = vrot.slane %v750_v13, %v2413_v30  ;;  %v696_v59 = vrot.slane %v555_v37, %v2413_v30  ;;  %v904_v52 = vcombine.low %v896_v25, %v903_v36  ;;  %v931_v16 = vrot.slane %v2564_v42, %v2413_v30 }
  0x61   : > { %769 = vst [vmem:[%s2644_s26] ss:$4 sm:$0xff] %v661_v21  ;;  %1921 = vst [vmem:[%s2644_s26 + $0x1] ss:$4 sm:$0xff] %v610_v55  ;;  %v697_v63 = vcombine.low %v675_v32, %v682_v43  ;;  %v945_v42 = vrot.slane %v2572_v26, %v2413_v30  ;;  %v988_v25 = vcombine.low %v2524_v53, %v2528_v54  ;;  %v1927_v23 = vrot.slane %v987_v39, 10 }
  0x62   : > { %612 = vst [vmem:[%s2650_s16] ss:$4 sm:$0xff] %v610_v55  ;;  %1918 = vst [vmem:[%s2650_s16 + $0x1] ss:$4 sm:$0xff] %v661_v21  ;;  %v765_v36 = vcombine.low %v757_v41, %v764_v14  ;;  %v698_v56 = vcombine.low %v689_v61, %v696_v59  ;;  %v946_v45 = vcombine.high %v924_v9, %v931_v16  ;;  %v1929_v15 = vrot.slane %v989_v48, 10 }
  0x63   : > { %906 = vst [vmem:[%s2630_s13] ss:$8 sm:$0xf] %v904_v52  ;;  %907 = vst [vmem:[%s2630_s13] ss:$8 sm:$0xf0] %v904_v52  ;;  %v705_v26 = vrot.slane %v697_v63, %v2413_v30  ;;  %v947_v53 = vcombine.high %v938_v47, %v945_v42  ;;  %v990_v54 = vcombine.low %v2543_v17, %v2547_v35  ;;  %v1928_v12 = vrot.slane %v988_v25, 10 }
  0x64   : > { %1922 = vst [vmem:[%s2644_s26 + $0x2] ss:$4 sm:$0xff] %v765_v36  ;;  %v712_v9 = vrot.slane %v698_v56, %v2413_v30  ;;  %1920 = vst [vmem:[%s2650_s16 + $0x3] ss:$4 sm:$0xff] %v765_v36  ;;  %v954_v58 = vrot.slane %v946_v45, %v2413_v30  ;;  %v1003_v17 = vadd.f32 %v1927_v23, %v2343_v0  ;;  %v1008_v35 = vstv %s2618_s12  ;;  %s2714_s12 = sld [smem:[#allocation4 + $0x4]] }
  0x65   : > { %v961_v46 = vrot.slane %v947_v53, %v2413_v30  ;;  %v1930_v50 = vrot.slane %v990_v54, 10  ;;  %v1004_v57 = vadd.f32 %v1928_v12, %v2348_v1  ;;  %v1005_v60 = vadd.f32 %v1929_v15, %v2353_v2 }
  0x66   : > { %v713_v39 = vcombine.low %v705_v26, %v712_v9  ;;  %v1067_v31 = vstv %s2623_s17  ;;  %v2710_v62 = vmul.f32 %v1008_v35, %v1003_v17 }
  0x67   : > { %v962_v40 = vcombine.low %v954_v58, %v961_v46  ;;  %v1006_v44 = vadd.f32 %v1930_v50, %v2358_v4  ;;  %v2712_v49 = vmul.f32 %v1067_v31, %v1003_v17  ;;  %v2720_v3 = vmul.f32 %v1008_v35, %v1004_v57 }
  0x68   : > { %1923 = vst [vmem:[%s2644_s26 + $0x3] ss:$4 sm:$0xff] %v713_v39  ;;  %1919 = vst [vmem:[%s2650_s16 + $0x2] ss:$4 sm:$0xff] %v713_v39  ;;  %v2722_v51 = vmul.f32 %v1008_v35, %v1005_v60  ;;  %v2724_v24 = vmul.f32 %v1067_v31, %v1004_v57  ;;  %v2726_v22 = vmul.f32 %v1067_v31, %v1005_v60  ;;  %s2221_s26 = smov [#allocation7]  }
  0x69   : > { %s2080_s16 = sshll.u32 %s2221_s26, 4  ;;  %s2081_s16 = int_to_ptr.vmem [resolvable:$false] %s2080_s16 }
  0x6a   : > { %s2082_s25 = scalar_lea.vmem %s2081_s16, 1024  ;;  %p2083_p11 = scmp.lt.s32.totalorder %s2697_s15, %s2081_s16 }
  0x6b   : > { %p2084_p12 = scmp.lt.s32.totalorder %s2082_s25, %s2076_s9 }
  0x6d   : > { %p2085_p13 = por %p2084_p12, %p2083_p11 }
  0x6f   : > { %p2086_p1 = pnand %p2085_p13, %p2079_p10 }
  0x71   : > { %2089 = shalt.err (!%p2086_p1)
}
  0x72   : > { %s2090_s4 = scalar_lea.hbm %s2691_s3, 512  ;;  %s2094_s26 = scalar_lea.hbm %s3018_s7, 1024 }
  0x73   : > { %p2091_p2 = scmp.ne.s32.totalorder %s2691_s3, %s2090_s4  ;;  %p2095_p6 = scmp.lt.u32.totalorder %s2691_s3, %s3018_s7 }
  0x74   : > { %p2096_p7 = scmp.lt.u32.totalorder %s2094_s26, %s2090_s4  ;;  %p2098_p9 = scmp.lt.u32.totalorder %s2090_s4, %s2691_s3 }
  0x75   : > { %p2092_p3 = pnand %p2091_p2, %p2322_p0 }
  0x76   : > { %p2097_p8 = por %p2096_p7, %p2095_p6 }
  0x77   : > { %p2093_p5 = pneg %p2092_p3 }
  0x78   : > { %p2099_p10 = por %p2098_p9, %p2097_p8 }
  0x7a   : > { %p2100_p11 = pnand %p2099_p10, %p2093_p5 }
  0x7c   : > { %2103 = shalt.err (!%p2100_p11)
}
  0x7d   : > { %s3048_s9 = scalar_lea.sflag [#allocation8], %s2656_s0  ;;  %1925 = vst [vmem:[%s2630_s13 + $0x1] ss:$8 sm:$0xf] %v962_v40  ;;  %v2761_v13 = vmul.f32 %v1008_v35, %v1006_v44  ;;  %v1023_v41 = vrot.slane %v2710_v62, %v2413_v30  ;;  %v2765_v37 = vmul.f32 %v1067_v31, %v1006_v44  ;;  %v1082_v32 = vrot.slane %v2712_v49, %v2413_v30  ;;  %s2104_s25 = scalar_lea.vmem %s2716_s11, 512 }
  0x7e   : > { %1977 = dma.vmem_to_hbm [thread:$0]  (%p2322_p0), %s2697_s15, 512, %s2691_s3, %s3048_s9   ;;  %1926 = vst [vmem:[%s2630_s13 + $0x1] ss:$8 sm:$0xf0] %v962_v40  ;;  %v1030_v21 = vrot.slane %v2720_v3, %v2413_v30  ;;  %v1037_v55 = vrot.slane %v2722_v51, %v2413_v30  ;;  %v1089_v43 = vrot.slane %v2724_v24, %v2413_v30  ;;  %v1096_v61 = vrot.slane %v2726_v22, %v2413_v30 }
  0x7f   : > { %s1600_s3 = scalar_lea.sflag [#allocation6], %s2386_s28  ;;  %p2105_p12 = scmp.ne.s32.totalorder %s2716_s11, %s2104_s25 }
  0x80   : > { %s2222_s15 = smov [#allocation5]  }
  0x81   : > { %p2106_p13 = pnand %p2105_p12, %p2322_p0  ;;  %s2108_s24 = sshll.u32 %s2222_s15, 4  ;;  %s2109_s24 = int_to_ptr.vmem [resolvable:$false] %s2108_s24 }
  0x82   : > { %s2110_s4 = scalar_lea.vmem %s2109_s24, 1024  ;;  %p2111_p2 = scmp.lt.s32.totalorder %s2716_s11, %s2109_s24 }
  0x83   : > { %p2107_p1 = pneg %p2106_p13  ;;  %p2112_p3 = scmp.lt.s32.totalorder %s2110_s4, %s2104_s25 }
  0x85   : > { %p2113_p5 = por %p2112_p3, %p2111_p2 }
  0x87   : > { %p2114_p6 = pnand %p2113_p5, %p2107_p1 }
  0x89   : > { %2117 = shalt.err (!%p2114_p6)
}
  0x8a   : > { %s2118_s28 = scalar_lea.hbm %s2707_s5, 512  ;;  %s2122_s26 = scalar_lea.hbm %s3017_s6, 1024 }
  0x8b   : > { %p2119_p7 = scmp.ne.s32.totalorder %s2707_s5, %s2118_s28  ;;  %p2123_p10 = scmp.lt.u32.totalorder %s2707_s5, %s3017_s6 }
  0x8c   : > { %p2124_p11 = scmp.lt.u32.totalorder %s2122_s26, %s2118_s28  ;;  %p2126_p13 = scmp.lt.u32.totalorder %s2118_s28, %s2707_s5 }
  0x8d   : > { %p2120_p8 = pnand %p2119_p7, %p2322_p0 }
  0x8e   : > { %p2125_p12 = por %p2124_p11, %p2123_p10 }
  0x8f   : > { %p2121_p9 = pneg %p2120_p8 }
  0x90   : > { %p2127_p1 = por %p2126_p13, %p2125_p12 }
  0x92   : > { %p2128_p2 = pnand %p2127_p1, %p2121_p9 }
  0x94   : > { %2131 = shalt.err (!%p2128_p2)
}
  0x95   : > { %1976 = dma.vmem_to_hbm [thread:$0]  (%p2322_p0), %s2716_s11, 512, %s2707_s5, %s1600_s3   ;;  %v1044_v14 = vrot.slane %v2761_v13, %v2413_v30  ;;  %v1103_v59 = vrot.slane %v2765_v37, %v2413_v30  ;;  %v1125_v52 = vrot.slane %v2365_v8, 6  ;;  %v1126_v16 = vrot.slane %v2372_v10, 6 }
  0x96   : > { %s2132_s25 = scalar_lea.vmem %s2673_s23, 128  ;;  %s2223_s15 = smov [#allocation9]  }
  0x97   : > { %p2133_p3 = scmp.ne.s32.totalorder %s2673_s23, %s2132_s25  ;;  %s2136_s24 = sshll.u32 %s2223_s15, 4  ;;  %s2137_s24 = int_to_ptr.vmem [resolvable:$false] %s2136_s24 }
  0x98   : > { %s2138_s4 = scalar_lea.vmem %s2137_s24, 256  ;;  %p2139_p7 = scmp.lt.s32.totalorder %s2673_s23, %s2137_s24 }
  0x99   : > { %p2134_p5 = pnand %p2133_p3, %p2322_p0  ;;  %p2140_p8 = scmp.lt.s32.totalorder %s2138_s4, %s2132_s25 }
  0x9b   : > { %p2135_p6 = pneg %p2134_p5  ;;  %p2141_p9 = por %p2140_p8, %p2139_p7 }
  0x9d   : > { %p2142_p10 = pnand %p2141_p9, %p2135_p6 }
  0x9f   : > { %2145 = shalt.err (!%p2142_p10)
}
  0xa0   : > { %s2146_s5 = scalar_lea.hbm %s2733_s2, 128  ;;  %s2150_s28 = scalar_lea.hbm %s3019_s8, 256 }
  0xa1   : > { %p2147_p11 = scmp.ne.s32.totalorder %s2733_s2, %s2146_s5  ;;  %p2151_p1 = scmp.lt.u32.totalorder %s2733_s2, %s3019_s8 }
  0xa2   : > { %p2152_p2 = scmp.lt.u32.totalorder %s2150_s28, %s2146_s5  ;;  %p2154_p5 = scmp.lt.u32.totalorder %s2146_s5, %s2733_s2 }
  0xa3   : > { %p2148_p12 = pnand %p2147_p11, %p2322_p0 }
  0xa4   : > { %p2153_p3 = por %p2152_p2, %p2151_p1 }
  0xa5   : > { %p2149_p13 = pneg %p2148_p12 }
  0xa6   : > { %p2155_p6 = por %p2154_p5, %p2153_p3 }
  0xa8   : > { %p2156_p7 = pnand %p2155_p6, %p2149_p13 }
  0xaa   : > { %2159 = shalt.err (!%p2156_p7)
}
  0xab   : > { %s3049_s26 = scalar_lea.sflag [#allocation8], %s2656_s0  ;;  %v1045_v63 = vcombine.low %v1023_v41, %v1030_v21  ;;  %v1104_v47 = vcombine.high %v1082_v32, %v1089_v43  ;;  %v1127_v42 = vrot.slane %v2376_v11, 6  ;;  %v1128_v25 = vrot.slane %v2396_v18, 6  ;;  %s2882_s27 = sld [smem:[#allocation4 + $0x6]] }
  0xac   : > { %1978 = dma.vmem_to_hbm [thread:$0]  (%p2322_p0), %s2673_s23, 128, %s2733_s2, %s3049_s26   ;;  %v1046_v36 = vcombine.low %v1037_v55, %v1044_v14  ;;  %v1105_v56 = vcombine.high %v1096_v61, %v1103_v59  ;;  %v1137_v45 = vmul.f32 %v2474_v19, %v474_v5  ;;  %v1138_v48 = vmul.f32 %v1125_v52, %v2476_v20 }
  0xad   : > { %v1053_v26 = vrot.slane %v1045_v63, %v2413_v30  ;;  %v1112_v53 = vrot.slane %v1104_v47, %v2413_v30  ;;  %v1139_v54 = vmul.f32 %v2478_v27, %v476_v6  ;;  %v1140_v23 = vmul.f32 %v1126_v16, %v2480_v28  ;;  %s2886_s23 = sld [smem:[#allocation4 + $0x7]]  ;;  %s2931_s0 = sld [smem:[#allocation4 + $0x8]] }
  0xae   : > { %v1060_v9 = vrot.slane %v1046_v36, %v2413_v30  ;;  %v1119_v58 = vrot.slane %v1105_v56, %v2413_v30  ;;  %v1141_v5 = vmul.f32 %v2482_v29, %v478_v7  ;;  %v1142_v12 = vmul.f32 %v1127_v42, %v2484_v33 }
  0xaf   : > { %v3050_v15 = vrot.slane %v2358_v4, 6  ;;  %v1144_v46 = vmul.f32 %v1128_v25, %v2491_v38  ;;  %v1153_v50 = vcombine.high %v1137_v45, %v1138_v48  ;;  %v1154_v17 = vcombine.high %v1139_v54, %v1140_v23 }
  0xb0   : > { %v1061_v35 = vcombine.low %v1053_v26, %v1060_v9  ;;  %v1120_v39 = vcombine.low %v1112_v53, %v1119_v58  ;;  %v1155_v57 = vcombine.high %v1141_v5, %v1142_v12  ;;  %v1166_v60 = vstv %s2714_s12  ;;  %s2938_s12 = sld [smem:[#allocation4 + $0x9]] }
  0xb1   : > { %v1143_v6 = vmul.f32 %v2486_v34, %v3050_v15  ;;  %v1161_v40 = vadd.f32 %v1153_v50, %v2343_v0  ;;  %v1162_v7 = vadd.f32 %v1154_v17, %v2348_v1  ;;  %v1225_v44 = vstv %s2728_s20  ;;  %v786_v15 = vld [vmem:[%s2428_s14 + $0x40] sm:$0x3]  ;;  %v788_v17 = vld [vmem:[%s2428_s14 + $0x50] sm:$0x3] }
  0xb2   : > { %1932 = vst [vmem:[%s2630_s13 + $0x2] ss:$8 sm:$0xf] %v1061_v35  ;;  %1933 = vst [vmem:[%s2630_s13 + $0x2] ss:$8 sm:$0xf0] %v1061_v35  ;;  %v1163_v62 = vadd.f32 %v1155_v57, %v2353_v2  ;;  %v3051_v49 = vcombine.low %v2343_v0, %v2343_v0  ;;  %v1292_v51 = vmul.f32 %v2476_v20, %v2343_v0  ;;  %v1328_v50 = vstv %s2882_s27 }
  0xb3   : > { %v1156_v31 = vcombine.high %v1143_v6, %v1144_v46  ;;  %1935 = vst [vmem:[%s2630_s13 + $0x3] ss:$8 sm:$0xf] %v1120_v39  ;;  %1936 = vst [vmem:[%s2630_s13 + $0x3] ss:$8 sm:$0xf0] %v1120_v39  ;;  %v3052_v24 = vcombine.low %v2348_v1, %v2348_v1  ;;  %v1167_v41 = vmul.f32 %v1166_v60, %v1161_v40 }
  0xb4   : > { %v1291_v3 = vmul.f32 %v3051_v49, %v2474_v19  ;;  %v1168_v37 = vmul.f32 %v1166_v60, %v1162_v7  ;;  %v1226_v32 = vmul.f32 %v1225_v44, %v1161_v40  ;;  %v1169_v21 = vmul.f32 %v1166_v60, %v1163_v62 }
  0xb5   : > { %v1293_v22 = vmul.f32 %v3052_v24, %v2478_v27  ;;  %v1164_v13 = vadd.f32 %v1156_v31, %v2358_v4  ;;  %v1227_v55 = vmul.f32 %v1225_v44, %v1162_v7  ;;  %v1228_v43 = vmul.f32 %v1225_v44, %v1163_v62  ;;  %v789_v31 = vld [vmem:[%s2428_s14 + $0x58] sm:$0x3] }
  0xb6   : > { %v1294_v19 = vmul.f32 %v2480_v28, %v2348_v1  ;;  %v1181_v61 = vrot.slane %v1167_v41, %v2413_v30  ;;  %v1188_v27 = vrot.slane %v1168_v37, %v2413_v30  ;;  %v1195_v59 = vrot.slane %v1169_v21, %v2413_v30 }
  0xb7   : > { %v1170_v20 = vmul.f32 %v1166_v60, %v1164_v13  ;;  %v1229_v14 = vmul.f32 %v1225_v44, %v1164_v13  ;;  %v1240_v52 = vrot.slane %v1226_v32, %v2413_v30  ;;  %v1247_v16 = vrot.slane %v1227_v55, %v2413_v30 }
  0xb8   : > { %v1254_v63 = vrot.slane %v1228_v43, %v2413_v30  ;;  %v1203_v28 = vcombine.low %v1181_v61, %v1188_v27  ;;  %v3053_v25 = vcombine.low %v2353_v2, %v2353_v2  ;;  %v1296_v45 = vmul.f32 %v2484_v33, %v2353_v2 }
  0xb9   : > { %v1202_v47 = vrot.slane %v1170_v20, %v2413_v30  ;;  %v1261_v42 = vrot.slane %v1229_v14, %v2413_v30  ;;  %v1262_v56 = vcombine.high %v1240_v52, %v1247_v16  ;;  %v3054_v48 = vcombine.low %v2358_v4, %v2358_v4  ;;  %v791_v20 = vld [vmem:[%s2428_s14 + $0x68] sm:$0x3]  ;;  %v792_v52 = vld [vmem:[%s2428_s14 + $0x70] sm:$0x3] }
  0xba   : > { %v1295_v36 = vmul.f32 %v3053_v25, %v2482_v29  ;;  %v1298_v53 = vmul.f32 %v2491_v38, %v2358_v4  ;;  %v1211_v23 = vrot.slane %v1203_v28, %v2413_v30  ;;  %v1307_v29 = vcombine.high %v1291_v3, %v1292_v51  ;;  %v787_v38 = vld [vmem:[%s2428_s14 + $0x48] sm:$0x3] }
  0xbb   : > { %v1297_v26 = vmul.f32 %v3054_v48, %v2486_v34  ;;  %v1204_v54 = vcombine.low %v1195_v59, %v1202_v47  ;;  %v1263_v9 = vcombine.high %v1254_v63, %v1261_v42  ;;  %v1270_v58 = vrot.slane %v1262_v56, %v2413_v30  ;;  %v793_v42 = vld [vmem:[%s2428_s14 + $0x78] sm:$0x3] }
  0xbc   : > { %v1308_v33 = vcombine.high %v1293_v22, %v1294_v19  ;;  %v1309_v5 = vcombine.high %v1295_v36, %v1296_v45  ;;  %v1943_v46 = vrot.slane %v1307_v29, 10  ;;  %v1387_v60 = vstv %s2886_s23  ;;  %v790_v19 = vld [vmem:[%s2428_s14 + $0x60] sm:$0x3] }
  0xbd   : > { %v1310_v12 = vcombine.high %v1297_v26, %v1298_v53  ;;  %v1218_v6 = vrot.slane %v1204_v54, %v2413_v30  ;;  %v1277_v34 = vrot.slane %v1263_v9, %v2413_v30  ;;  %v1445_v62 = vmul.f32 0.1, %v786_v15 }
  0xbe   : > { %v1944_v35 = vrot.slane %v1308_v33, 10  ;;  %v1945_v39 = vrot.slane %v1309_v5, 10  ;;  %v1323_v44 = vadd.f32 %v1943_v46, %v2343_v0  ;;  %v1446_v24 = vmul.f32 0.1, %v787_v38 }
  0xbf   : > { %v1946_v57 = vrot.slane %v1310_v12, 10  ;;  %v1219_v40 = vcombine.low %v1211_v23, %v1218_v6  ;;  %v1278_v7 = vcombine.low %v1270_v58, %v1277_v34  ;;  %v1447_v41 = vmul.f32 0.1, %v788_v17 }
  0xc0   : > { %v1324_v49 = vadd.f32 %v1944_v35, %v2348_v1  ;;  %v1325_v3 = vadd.f32 %v1945_v39, %v2353_v2  ;;  %v1329_v22 = vmul.f32 %v1328_v50, %v1323_v44  ;;  %v1388_v13 = vmul.f32 %v1387_v60, %v1323_v44 }
  0xc1   : > { %v1326_v51 = vadd.f32 %v1946_v57, %v2358_v4  ;;  %1938 = vst [vmem:[%s2630_s13 + $0x4] ss:$8 sm:$0xf] %v1219_v40  ;;  %1939 = vst [vmem:[%s2630_s13 + $0x4] ss:$8 sm:$0xf0] %v1219_v40 }
  0xc2   : > { %1941 = vst [vmem:[%s2630_s13 + $0x5] ss:$8 sm:$0xf] %v1278_v7  ;;  %1942 = vst [vmem:[%s2630_s13 + $0x5] ss:$8 sm:$0xf0] %v1278_v7  ;;  %v1330_v32 = vmul.f32 %v1328_v50, %v1324_v49  ;;  %v1331_v21 = vmul.f32 %v1328_v50, %v1325_v3  ;;  %v1389_v43 = vmul.f32 %v1387_v60, %v1324_v49 }
  0xc3   : > { %v1448_v37 = vmul.f32 0.1, %v789_v31  ;;  %v1332_v55 = vmul.f32 %v1328_v50, %v1326_v51  ;;  %v1343_v61 = vrot.slane %v1329_v22, %v2413_v30  ;;  %v1390_v27 = vmul.f32 %v1387_v60, %v1325_v3 }
  0xc4   : > { %v1391_v14 = vmul.f32 %v1387_v60, %v1326_v51  ;;  %v1402_v59 = vrot.slane %v1388_v13, %v2413_v30  ;;  %v1350_v16 = vrot.slane %v1330_v32, %v2413_v30  ;;  %v1357_v63 = vrot.slane %v1331_v21, %v2413_v30 }
  0xc5   : > { %v1364_v47 = vrot.slane %v1332_v55, %v2413_v30  ;;  %v1409_v28 = vrot.slane %v1389_v43, %v2413_v30  ;;  %v1416_v25 = vrot.slane %v1390_v27, %v2413_v30  ;;  %v1449_v56 = vmul.f32 0.1, %v790_v19 }
  0xc6   : > { %v1423_v36 = vrot.slane %v1391_v14, %v2413_v30  ;;  %v1450_v45 = vmul.f32 0.1, %v791_v20  ;;  %v1365_v48 = vcombine.low %v1343_v61, %v1350_v16  ;;  %v1451_v54 = vmul.f32 0.1, %v792_v52 }
  0xc7   : > { %v1366_v26 = vcombine.low %v1357_v63, %v1364_v47  ;;  %v1424_v53 = vcombine.high %v1402_v59, %v1409_v28  ;;  %v1452_v9 = vmul.f32 0.1, %v793_v42  ;;  %v3055_v29 = vrot.slane %v2343_v0, 2 }
  0xc8   : > { %v1425_v23 = vcombine.high %v1416_v25, %v1423_v36  ;;  %v3056_v33 = vrot.slane %v2365_v8, 2  ;;  %v1373_v12 = vrot.slane %v1365_v48, %v2413_v30  ;;  %v3057_v34 = vrot.slane %v2348_v1, 2 }
  0xc9   : > { %v1453_v58 = vmul.f32 %v1445_v62, %v3055_v29  ;;  %v1380_v15 = vrot.slane %v1366_v26, %v2413_v30  ;;  %v1432_v6 = vrot.slane %v1424_v53, %v2413_v30  ;;  %v3058_v38 = vrot.slane %v2372_v10, 2 }
  0xca   : > { %v1454_v5 = vmul.f32 %v1446_v24, %v3056_v33  ;;  %v1455_v46 = vmul.f32 %v1447_v41, %v3057_v34  ;;  %v1439_v50 = vrot.slane %v1425_v23, %v2413_v30  ;;  %v3059_v8 = vrot.slane %v2353_v2, 2 }
  0xcb   : > { %v1456_v17 = vmul.f32 %v1448_v37, %v3058_v38  ;;  %v3060_v39 = vrot.slane %v2376_v11, 2  ;;  %v1381_v60 = vcombine.low %v1373_v12, %v1380_v15  ;;  %v3061_v31 = vrot.slane %v2358_v4, 2 }
  0xcc   : > { %v1457_v35 = vmul.f32 %v1449_v56, %v3059_v8  ;;  %v3062_v7 = vrot.slane %v2396_v18, 2  ;;  %v1469_v62 = vcombine.low %v1453_v58, %v1454_v5  ;;  %v1440_v49 = vcombine.low %v1432_v6, %v1439_v50 }
  0xcd   : > { %v1458_v57 = vmul.f32 %v1450_v45, %v3060_v39  ;;  %v1459_v40 = vmul.f32 %v1451_v54, %v3061_v31  ;;  %v1470_v10 = vcombine.low %v1455_v46, %v1456_v17  ;;  %v1482_v51 = vstv %s2931_s0  ;;  %1948 = vst [vmem:[%s2630_s13 + $0x6] ss:$8 sm:$0xf] %v1381_v60  ;;  %1949 = vst [vmem:[%s2630_s13 + $0x6] ss:$8 sm:$0xf0] %v1381_v60 }
  0xce   : > { %v1460_v44 = vmul.f32 %v1452_v9, %v3062_v7  ;;  %v1477_v22 = vadd.f32 %v1469_v62, %v2343_v0  ;;  %v1541_v11 = vstv %s2938_s12  ;;  %1951 = vst [vmem:[%s2630_s13 + $0x7] ss:$8 sm:$0xf] %v1440_v49  ;;  %1952 = vst [vmem:[%s2630_s13 + $0x7] ss:$8 sm:$0xf0] %v1440_v49 }
  0xcf   : > { %v1471_v3 = vcombine.low %v1457_v35, %v1458_v57  ;;  %v1478_v13 = vadd.f32 %v1470_v10, %v2348_v1 }
  0xd0   : > { %v1472_v24 = vcombine.low %v1459_v40, %v1460_v44  ;;  %v1483_v37 = vmul.f32 %v1482_v51, %v1477_v22  ;;  %v1542_v32 = vmul.f32 %v1541_v11, %v1477_v22 }
  0xd1   : > { %v1479_v41 = vadd.f32 %v1471_v3, %v2353_v2  ;;  %v1484_v21 = vmul.f32 %v1482_v51, %v1478_v13  ;;  %v1543_v43 = vmul.f32 %v1541_v11, %v1478_v13 }
  0xd2   : > { %v1480_v18 = vadd.f32 %v1472_v24, %v2358_v4  ;;  %v1497_v61 = vrot.slane %v1483_v37, %v2413_v30  ;;  %v1556_v0 = vrot.slane %v1542_v32, %v2413_v30 }
  0xd3   : > { %v1485_v55 = vmul.f32 %v1482_v51, %v1479_v41  ;;  %v1544_v19 = vmul.f32 %v1541_v11, %v1479_v41  ;;  %v1504_v14 = vrot.slane %v1484_v21, %v2413_v30  ;;  %v1563_v2 = vrot.slane %v1543_v43, %v2413_v30 }
  0xd4   : > { %v1486_v20 = vmul.f32 %v1482_v51, %v1480_v18  ;;  %v1545_v27 = vmul.f32 %v1541_v11, %v1480_v18 }
  0xd5   : > { %v1511_v1 = vrot.slane %v1485_v55, %v2413_v30  ;;  %v1570_v4 = vrot.slane %v1544_v19, %v2413_v30  ;;  %v1519_v16 = vcombine.low %v1497_v61, %v1504_v14  ;;  %v1578_v63 = vcombine.high %v1556_v0, %v1563_v2 }
  0xd6   : > { %v1518_v59 = vrot.slane %v1486_v20, %v2413_v30  ;;  %v1577_v52 = vrot.slane %v1545_v27, %v2413_v30 }
  0xd7   : > { %v1527_v42 = vrot.slane %v1519_v16, %v2413_v30  ;;  %v1586_v25 = vrot.slane %v1578_v63, %v2413_v30 }
  0xd8   : > { %v1520_v47 = vcombine.low %v1511_v1, %v1518_v59  ;;  %v1579_v28 = vcombine.high %v1570_v4, %v1577_v52 }
  0xda   : > { %v1534_v36 = vrot.slane %v1520_v47, %v2413_v30  ;;  %v1593_v56 = vrot.slane %v1579_v28, %v2413_v30 }
  0xdc   : > { %v1535_v45 = vcombine.low %v1527_v42, %v1534_v36  ;;  %v1594_v48 = vcombine.low %v1586_v25, %v1593_v56 }
  0xde   : > { %1954 = vst [vmem:[%s2630_s13 + $0x40] ss:$8 sm:$0xf] %v1535_v45  ;;  %1955 = vst [vmem:[%s2630_s13 + $0x40] ss:$8 sm:$0xf0] %v1535_v45 }
  0xdf   : > { %1957 = vst [vmem:[%s2630_s13 + $0x41] ss:$8 sm:$0xf] %v1594_v48  ;;  %1958 = vst [vmem:[%s2630_s13 + $0x41] ss:$8 sm:$0xf0] %v1594_v48 }
  0xe0 PF: > { %p1992_p0 = scmp.ge.s32.totalorder %s2216_s22, 2  ;;  %s1683_s14 = sand.u32 1, %s2196_s1  }
  0xe1   : > { %s1684_s20 = scalar_lea.sflag [#allocation6], %s1683_s14 }
  0xe2   : > { %p1983_p8 = pnand %p1992_p0, %p2331_p4 }
  0xe4   : > { %2187 = dma.done.wait (!%p1983_p8), %s1684_s20, 512  }
  0xe5   : > { %2189 = vsyncadd (!%p1983_p8), %s1684_s20, 4294966784  ;;  %s3063_s2 = sadd.s32 4294967294, %s2216_s22  }
  0xe6   : > { %s1692_s16 = sand.u32 1, %s3063_s2  }
  0xe7   : > { %s1693_s9 = scalar_lea.sflag [#allocation8], %s1692_s16 }
  0xe8   : > { %2191 = dma.done.wait (!%p1983_p8), %s1693_s9, 640  }
  0xe9   : > { %2193 = vsyncadd (!%p1983_p8), %s1693_s9, 4294966656  ;;  %s36_s22 = sadd.s32 1, %s2216_s22   ;;  %s3064_s13 = sld [smem:[#allocation13_spill]] }
  0xea   : > { %p33_p9 = scmp.ge.s32.totalorder %s36_s22, 4   ;;  %s3065_s1 = smov %s2200_s18 }
  0xeb   : > { %s3066_s18 = smov %s2204_s19  ;;  %s3067_s19 = smov %s2337_s30 }
  0xec   : > { %s3068_s20 = smov %s2212_s21  ;;  %35 = sbr.rel (!%p33_p9) target bundleno = 34 (0x22), region = 139 }
  0xef   : > { %s3069_s21 = smov %s3064_s13 }
  0xf3   :  { %1719 = vsyncpa [#allocation6], 1 }
  0xf4   :  { %1721 = vsyncpa [#allocation6 + $0x1], 1 }
  0xf5   :  { %1722 = vsyncpa [#allocation8], 1 }
  0xf6   :  { %1724 = vsyncpa [#allocation8 + $0x1], 1 }

</bundles_post_ra>
